<compile_context>
chip_gen: v6e
topology: v6e:2x2x1
jax: 0.10.0
libtpu: 0.0.40
codegen_flags: <defaults>
</compile_context>

<pallas_src>
import jax
import jax.numpy as jnp
from jax.experimental import pallas as pl
from jax.experimental.pallas import tpu as pltpu


def _round_up(x, m):
    return (x + m - 1) // m * m


def _pick_time_chunk(T, cap):
    """Largest divisor of T that is <= cap, so the grid tiles T exactly."""
    for tc in range(min(T, cap), 0, -1):
        if T % tc == 0:
            return tc
    return 1


# ---------------------------------------------------------------------------
# Kernel 1: sequential recurrence   h_t = tanh(E_t + h_{t-1} @ W_hh^T)
#   E already contains  x_t @ W_ih^T + b_ih + b_hh  (embedding gather + bias).
#   grid = (T // Tc,); each grid step handles Tc timesteps.
#   The final-state output hT has a constant index_map, so it stays resident in
#   VMEM across the (arbitrary) grid axis and doubles as the carried state.
# ---------------------------------------------------------------------------
def rnn_recurrence_kernel(e_ref, whh_ref, h0_ref, y_ref, hT_ref):
    c = pl.program_id(0)

    @pl.when(c == 0)
    def _init():
        hT_ref[...] = h0_ref[...]

    whh = whh_ref[...]          # (H, H), hoisted out of the unrolled loop
    tc = e_ref.shape[0]         # static chunk length

    def step(i, h):
        h_new = jnp.tanh(
            e_ref[i]
            + jnp.dot(h.astype(whh.dtype), whh,
                      preferred_element_type=jnp.float32)
        )
        y_ref[i] = h_new
        return h_new

    hT_ref[...] = jax.lax.fori_loop(0, tc, step, hT_ref[...], unroll=True)


# ---------------------------------------------------------------------------
# Kernel 2: output projection  logits = Y_flat @ W_out^T + b_out
#   Plain tiled matmul over independent row tiles ('parallel' grid).
# ---------------------------------------------------------------------------
def output_proj_kernel(y_ref, wout_ref, bout_ref, out_ref):
    out_ref[...] = (
        jnp.dot(y_ref[...].astype(wout_ref.dtype), wout_ref[...],
                preferred_element_type=jnp.float32)
        + bout_ref[...]
    )


def rnn_model_forward(inputs, h0, params, vocab_size, *,
                      use_bf16=False, time_chunk=32, proj_tile_m=128):
    """inputs: (B, T) int32 token ids; h0: (1, B, H) float32.
    Returns (output (T*B, V) float32, state (1, B, H) float32)."""
    w_ih, w_hh, b_ih, b_hh, w_out, b_out = params
    B, T = inputs.shape
    H = w_ih.shape[0]
    V = vocab_size
    wdt = jnp.bfloat16 if use_bf16 else jnp.float32

    # one_hot(x) @ W_ih^T is an embedding lookup: row `token` of W_ih^T.
    # Fold both RNN biases in here so the kernel adds nothing per step.
    emb = w_ih.T.astype(jnp.float32)                       # (V, H)
    bias = (b_ih + b_hh).astype(jnp.float32)               # (H,)
    E = jnp.take(emb, inputs.T, axis=0) + bias             # (T, B, H)

    # Pad batch to a sublane multiple of 8.  The recurrence is row-wise
    # independent, so padded rows never contaminate real ones.
    Bp = _round_up(B, 8)
    h0_2d = h0[0].astype(jnp.float32)
    if Bp != B:
        E = jnp.pad(E, ((0, 0), (0, Bp - B), (0, 0)))
        h0_2d = jnp.pad(h0_2d, ((0, Bp - B), (0, 0)))

    Tc = _pick_time_chunk(T, time_chunk)
    whh_t = w_hh.T.astype(wdt)                             # (H, H)

    rec_cost = pl.CostEstimate(
        flops=2 * T * Bp * H * H + 2 * T * Bp * H,
        transcendentals=T * Bp * H,
        bytes_accessed=(4 * (2 * T * Bp * H + 2 * Bp * H)
                        + whh_t.dtype.itemsize * H * H),
    )
    Y, hT = pl.pallas_call(
        rnn_recurrence_kernel,
        out_shape=(
            jax.ShapeDtypeStruct((T, Bp, H), jnp.float32),   # Y (all h_t)
            jax.ShapeDtypeStruct((Bp, H), jnp.float32),      # final state
        ),
        grid_spec=pltpu.PrefetchScalarGridSpec(
            num_scalar_prefetch=0,
            grid=(T // Tc,),
            in_specs=[
                pl.BlockSpec((Tc, Bp, H), lambda c: (c, 0, 0)),   # E chunk
                pl.BlockSpec((H, H), lambda c: (0, 0)),            # W_hh^T
                pl.BlockSpec((Bp, H), lambda c: (0, 0)),           # h0
            ],
            out_specs=[
                pl.BlockSpec((Tc, Bp, H), lambda c: (c, 0, 0)),    # Y chunk
                pl.BlockSpec((Bp, H), lambda c: (0, 0)),           # hT (carry)
            ],
        ),
        compiler_params=pltpu.CompilerParams(
            # true recurrence over time -> must stay sequential
            dimension_semantics=("arbitrary",),
        ),
        cost_estimate=rec_cost,
    )(E, whh_t, h0_2d)

    # --- output projection: (T*Bp, H) @ (H, V) + b_out, tiled & parallel ----
    M = T * Bp                                   # multiple of 8 by construction
    TM = min(proj_tile_m, M)
    Mp = _round_up(M, TM)
    Yf = Y.reshape(M, H)
    if Mp != M:
        Yf = jnp.pad(Yf, ((0, Mp - M), (0, 0)))
    wout_t = w_out.T.astype(wdt)                           # (H, V)
    bout = b_out.reshape(1, V).astype(jnp.float32)

    proj_cost = pl.CostEstimate(
        flops=2 * Mp * H * V,
        transcendentals=0,
        bytes_accessed=(4 * Mp * H + wout_t.dtype.itemsize * H * V
                        + 4 * Mp * V + 4 * V),
    )
    logits_p = pl.pallas_call(
        output_proj_kernel,
        out_shape=jax.ShapeDtypeStruct((Mp, V), jnp.float32),
        grid_spec=pltpu.PrefetchScalarGridSpec(
            num_scalar_prefetch=0,
            grid=(Mp // TM,),
            in_specs=[
                pl.BlockSpec((TM, H), lambda m: (m, 0)),   # Y row tile
                pl.BlockSpec((H, V), lambda m: (0, 0)),     # W_out^T
                pl.BlockSpec((1, V), lambda m: (0, 0)),     # b_out
            ],
            out_specs=pl.BlockSpec((TM, V), lambda m: (m, 0)),
        ),
        compiler_params=pltpu.CompilerParams(
            # independent row tiles -> megacore-shardable on v7x
            dimension_semantics=("parallel",),
        ),
        cost_estimate=proj_cost,
    )(Yf, wout_t, bout)
    # TODO(synk): for realistic vocab sizes, also tile V with a second
    # 'parallel' grid axis and set vmem_limit_bytes (v7x has 64 MiB VMEM) so
    # W_out^T is never loaded whole.

    logits = logits_p[:M].reshape(T, Bp, V)[:, :B].reshape(T * B, V)
    state = hT[:B][None]                                   # (1, B, H)
    return logits, state


def reference_forward(inputs, h0, params, vocab_size):
    """Pure-JAX reference (lax.scan) for correctness check."""
    w_ih, w_hh, b_ih, b_hh, w_out, b_out = params
    X = jax.nn.one_hot(inputs.T, vocab_size, dtype=jnp.float32)

    def step(h, x_t):
        h_new = jnp.tanh(x_t @ w_ih.T + b_ih + h @ w_hh.T + b_hh)
        return h_new, h_new

    hT, Y = jax.lax.scan(step, h0[0], X)
    out = Y.reshape(-1, Y.shape[-1]) @ w_out.T + b_out
    return out, hT[None]


if __name__ == "__main__":
    batch, seq, hidden, vocab = 4, 12, 32, 32

    key = jax.random.PRNGKey(0)
    ks = jax.random.split(key, 7)
    scale = 1.0 / jnp.sqrt(hidden)
    # Deterministic synthetic parameters (PyTorch-default-style uniform init).
    w_ih = jax.random.uniform(ks[0], (hidden, vocab), jnp.float32, -scale, scale)
    w_hh = jax.random.uniform(ks[1], (hidden, hidden), jnp.float32, -scale, scale)
    b_ih = jax.random.uniform(ks[2], (hidden,), jnp.float32, -scale, scale)
    b_hh = jax.random.uniform(ks[3], (hidden,), jnp.float32, -scale, scale)
    w_out = jax.random.uniform(ks[4], (vocab, hidden), jnp.float32, -scale, scale)
    b_out = jax.random.uniform(ks[5], (vocab,), jnp.float32, -scale, scale)
    params = (w_ih, w_hh, b_ih, b_hh, w_out, b_out)

    inputs = jax.random.randint(ks[6], (batch, seq), 0, vocab, dtype=jnp.int32)
    h0 = jnp.zeros((1, batch, hidden), jnp.float32)  # begin_state()

    ref_out, ref_state = reference_forward(inputs, h0, params, vocab)

    # f32 path with multiple time-chunks (exercises the carried VMEM state).
    out, state = rnn_model_forward(inputs, h0, params, vocab,
                                   use_bf16=False, time_chunk=4)
    out, state = jax.block_until_ready((out, state))
    assert out.shape == (seq * batch, vocab)
    assert state.shape == (1, batch, hidden)
    assert jnp.allclose(out, ref_out, atol=1e-5, rtol=1e-5)
    assert jnp.allclose(state, ref_state, atol=1e-5, rtol=1e-5)

    # bf16-weight path (MXU-friendly on v6e/v7x), looser tolerance.
    out16, state16 = rnn_model_forward(inputs, h0, params, vocab,
                                       use_bf16=True, time_chunk=32)
    out16, state16 = jax.block_until_ready((out16, state16))
    assert jnp.allclose(out16, ref_out, atol=5e-2, rtol=5e-2)
    assert jnp.allclose(state16, ref_state, atol=5e-2, rtol=5e-2)

    print("KERNEL_OK")
</pallas_src>

<mosaic_0001>
module attributes {stable_mosaic.version = 11 : i64} {
  func.func @rnn_recurrence_kernel(%arg0: i32, %arg1: memref<4x8x32xf32, #tpu.memory_space<vmem>>, %arg2: memref<32x32xf32, #tpu.memory_space<vmem>>, %arg3: memref<8x32xf32, #tpu.memory_space<vmem>>, %arg4: memref<4x8x32xf32, #tpu.memory_space<vmem>>, %arg5: memref<8x32xf32, #tpu.memory_space<vmem>>) attributes {dimension_semantics = [#tpu.dimension_semantics<arbitrary>], iteration_bounds = array<i64: 3>, scalar_prefetch = 0 : i64, scratch_operands = 0 : i64, tpu.core_type = #tpu.core_type<tc>, window_params = [{transform_indices = @transform_0, window_bounds = array<i64: 4, 8, 32>}, {pipeline_mode = #tpu.pipeline_mode<synchronous>, transform_indices = @transform_1, window_bounds = array<i64: 32, 32>}, {pipeline_mode = #tpu.pipeline_mode<synchronous>, transform_indices = @transform_2, window_bounds = array<i64: 8, 32>}, {transform_indices = @transform_3, window_bounds = array<i64: 4, 8, 32>}, {pipeline_mode = #tpu.pipeline_mode<synchronous>, transform_indices = @transform_4, window_bounds = array<i64: 8, 32>}]} {
    %c0_i32 = arith.constant 0 : i32
    %0 = arith.cmpi eq, %arg0, %c0_i32 : i32
    %1 = arith.extui %0 : i1 to i32
    %c0_i32_0 = arith.constant 0 : i32
    %2 = arith.cmpi ne, %1, %c0_i32_0 : i32
    scf.if %2 {
      %c0_26 = arith.constant 0 : index
      %c0_27 = arith.constant 0 : index
      %46 = vector.load %arg3[%c0_26, %c0_27] : memref<8x32xf32, #tpu.memory_space<vmem>>, vector<8x32xf32>
      %c0_28 = arith.constant 0 : index
      %c0_29 = arith.constant 0 : index
      %47 = vector.load %arg5[%c0_28, %c0_29] : memref<8x32xf32, #tpu.memory_space<vmem>>, vector<8x32xf32>
      tpu.vector_store %arg5[%c0_28, %c0_29], %46 {strides = array<i32>} : memref<8x32xf32, #tpu.memory_space<vmem>>, vector<8x32xf32>,
    } else {
    }
    %c0 = arith.constant 0 : index
    %c0_1 = arith.constant 0 : index
    %3 = vector.load %arg2[%c0, %c0_1] : memref<32x32xf32, #tpu.memory_space<vmem>>, vector<32x32xf32>
    %c0_2 = arith.constant 0 : index
    %c0_3 = arith.constant 0 : index
    %4 = vector.load %arg5[%c0_2, %c0_3] : memref<8x32xf32, #tpu.memory_space<vmem>>, vector<8x32xf32>
    %c0_i32_4 = arith.constant 0 : i32
    %5 = arith.index_cast %c0_i32_4 : i32 to index
    %c0_5 = arith.constant 0 : index
    %c0_6 = arith.constant 0 : index
    %6 = vector.load %arg1[%5, %c0_5, %c0_6] : memref<4x8x32xf32, #tpu.memory_space<vmem>>, vector<1x8x32xf32>
    %7 = vector.shape_cast %6 : vector<1x8x32xf32> to vector<8x32xf32>
    %cst = arith.constant dense<0.000000e+00> : vector<8x32xf32>
    %8 = tpu.matmul %4, %3, %cst {dimension_numbers = #tpu.dot_dimension_numbers<[1], [0], [0], [1], [0, 0, 1, 1], [], []>} : vector<8x32xf32>, vector<32x32xf32>, vector<8x32xf32> -> vector<8x32xf32>
    %9 = arith.addf %7, %8 : vector<8x32xf32>
    %10 = math.tanh %9 : vector<8x32xf32>
    %11 = arith.index_cast %c0_i32_4 : i32 to index
    %c0_7 = arith.constant 0 : index
    %c0_8 = arith.constant 0 : index
    %12 = vector.load %arg4[%11, %c0_7, %c0_8] : memref<4x8x32xf32, #tpu.memory_space<vmem>>, vector<1x8x32xf32>
    %13 = vector.shape_cast %12 : vector<1x8x32xf32> to vector<8x32xf32>
    %14 = vector.shape_cast %10 : vector<8x32xf32> to vector<1x8x32xf32>
    tpu.vector_store %arg4[%11, %c0_7, %c0_8], %14 {strides = array<i32>} : memref<4x8x32xf32, #tpu.memory_space<vmem>>, vector<1x8x32xf32>,
    %c1_i32 = arith.constant 1 : i32
    %15 = arith.index_cast %c1_i32 : i32 to index
    %c0_9 = arith.constant 0 : index
    %c0_10 = arith.constant 0 : index
    %16 = vector.load %arg1[%15, %c0_9, %c0_10] : memref<4x8x32xf32, #tpu.memory_space<vmem>>, vector<1x8x32xf32>
    %17 = vector.shape_cast %16 : vector<1x8x32xf32> to vector<8x32xf32>
    %cst_11 = arith.constant dense<0.000000e+00> : vector<8x32xf32>
    %18 = tpu.matmul %10, %3, %cst_11 {dimension_numbers = #tpu.dot_dimension_numbers<[1], [0], [0], [1], [0, 0, 1, 1], [], []>} : vector<8x32xf32>, vector<32x32xf32>, vector<8x32xf32> -> vector<8x32xf32>
    %19 = arith.addf %17, %18 : vector<8x32xf32>
    %20 = math.tanh %19 : vector<8x32xf32>
    %21 = arith.index_cast %c1_i32 : i32 to index
    %c0_12 = arith.constant 0 : index
    %c0_13 = arith.constant 0 : index
    %22 = vector.load %arg4[%21, %c0_12, %c0_13] : memref<4x8x32xf32, #tpu.memory_space<vmem>>, vector<1x8x32xf32>
    %23 = vector.shape_cast %22 : vector<1x8x32xf32> to vector<8x32xf32>
    %24 = vector.shape_cast %20 : vector<8x32xf32> to vector<1x8x32xf32>
    tpu.vector_store %arg4[%21, %c0_12, %c0_13], %24 {strides = array<i32>} : memref<4x8x32xf32, #tpu.memory_space<vmem>>, vector<1x8x32xf32>,
    %c2_i32 = arith.constant 2 : i32
    %25 = arith.index_cast %c2_i32 : i32 to index
    %c0_14 = arith.constant 0 : index
    %c0_15 = arith.constant 0 : index
    %26 = vector.load %arg1[%25, %c0_14, %c0_15] : memref<4x8x32xf32, #tpu.memory_space<vmem>>, vector<1x8x32xf32>
    %27 = vector.shape_cast %26 : vector<1x8x32xf32> to vector<8x32xf32>
    %cst_16 = arith.constant dense<0.000000e+00> : vector<8x32xf32>
    %28 = tpu.matmul %20, %3, %cst_16 {dimension_numbers = #tpu.dot_dimension_numbers<[1], [0], [0], [1], [0, 0, 1, 1], [], []>} : vector<8x32xf32>, vector<32x32xf32>, vector<8x32xf32> -> vector<8x32xf32>
    %29 = arith.addf %27, %28 : vector<8x32xf32>
    %30 = math.tanh %29 : vector<8x32xf32>
    %31 = arith.index_cast %c2_i32 : i32 to index
    %c0_17 = arith.constant 0 : index
    %c0_18 = arith.constant 0 : index
    %32 = vector.load %arg4[%31, %c0_17, %c0_18] : memref<4x8x32xf32, #tpu.memory_space<vmem>>, vector<1x8x32xf32>
    %33 = vector.shape_cast %32 : vector<1x8x32xf32> to vector<8x32xf32>
    %34 = vector.shape_cast %30 : vector<8x32xf32> to vector<1x8x32xf32>
    tpu.vector_store %arg4[%31, %c0_17, %c0_18], %34 {strides = array<i32>} : memref<4x8x32xf32, #tpu.memory_space<vmem>>, vector<1x8x32xf32>,
    %c3_i32 = arith.constant 3 : i32
    %35 = arith.index_cast %c3_i32 : i32 to index
    %c0_19 = arith.constant 0 : index
    %c0_20 = arith.constant 0 : index
    %36 = vector.load %arg1[%35, %c0_19, %c0_20] : memref<4x8x32xf32, #tpu.memory_space<vmem>>, vector<1x8x32xf32>
    %37 = vector.shape_cast %36 : vector<1x8x32xf32> to vector<8x32xf32>
    %cst_21 = arith.constant dense<0.000000e+00> : vector<8x32xf32>
    %38 = tpu.matmul %30, %3, %cst_21 {dimension_numbers = #tpu.dot_dimension_numbers<[1], [0], [0], [1], [0, 0, 1, 1], [], []>} : vector<8x32xf32>, vector<32x32xf32>, vector<8x32xf32> -> vector<8x32xf32>
    %39 = arith.addf %37, %38 : vector<8x32xf32>
    %40 = math.tanh %39 : vector<8x32xf32>
    %41 = arith.index_cast %c3_i32 : i32 to index
    %c0_22 = arith.constant 0 : index
    %c0_23 = arith.constant 0 : index
    %42 = vector.load %arg4[%41, %c0_22, %c0_23] : memref<4x8x32xf32, #tpu.memory_space<vmem>>, vector<1x8x32xf32>
    %43 = vector.shape_cast %42 : vector<1x8x32xf32> to vector<8x32xf32>
    %44 = vector.shape_cast %40 : vector<8x32xf32> to vector<1x8x32xf32>
    tpu.vector_store %arg4[%41, %c0_22, %c0_23], %44 {strides = array<i32>} : memref<4x8x32xf32, #tpu.memory_space<vmem>>, vector<1x8x32xf32>,
    %c4_i32 = arith.constant 4 : i32
    %c0_24 = arith.constant 0 : index
    %c0_25 = arith.constant 0 : index
    %45 = vector.load %arg5[%c0_24, %c0_25] : memref<8x32xf32, #tpu.memory_space<vmem>>, vector<8x32xf32>
    tpu.vector_store %arg5[%c0_24, %c0_25], %40 {strides = array<i32>} : memref<8x32xf32, #tpu.memory_space<vmem>>, vector<8x32xf32>,
    return
  }
  func.func @transform_0(%arg0: i32) -> (i32, i32, i32) {
    %c0_i32 = arith.constant 0 : i32
    %c0_i32_0 = arith.constant 0 : i32
    %c0_i32_1 = arith.constant 0 : i32
    return %arg0, %c0_i32, %c0_i32_0 : i32, i32, i32
  }
  func.func @transform_1(%arg0: i32) -> (i32, i32) {
    %c0_i32 = arith.constant 0 : i32
    %c0_i32_0 = arith.constant 0 : i32
    %c0_i32_1 = arith.constant 0 : i32
    return %c0_i32, %c0_i32_0 : i32, i32
  }
  func.func @transform_2(%arg0: i32) -> (i32, i32) {
    %c0_i32 = arith.constant 0 : i32
    %c0_i32_0 = arith.constant 0 : i32
    %c0_i32_1 = arith.constant 0 : i32
    return %c0_i32, %c0_i32_0 : i32, i32
  }
  func.func @transform_3(%arg0: i32) -> (i32, i32, i32) {
    %c0_i32 = arith.constant 0 : i32
    %c0_i32_0 = arith.constant 0 : i32
    %c0_i32_1 = arith.constant 0 : i32
    return %arg0, %c0_i32, %c0_i32_0 : i32, i32, i32
  }
  func.func @transform_4(%arg0: i32) -> (i32, i32) {
    %c0_i32 = arith.constant 0 : i32
    %c0_i32_0 = arith.constant 0 : i32
    %c0_i32_1 = arith.constant 0 : i32
    return %c0_i32, %c0_i32_0 : i32, i32
  }
}

</mosaic_0001>

<bundles_post_ra>
// kernel: tpu_custom_call.1
= control target key start
LH: loop header
LB: loop body
LE: loop exit
PB: predicated region body
PF: predicated region fallthrough
CT: control target
= control target key end

     0   :  { %10 = vsyncpa [#allocation3], 0  ;;  %s1338_s0 = inlined_call_operand.hbm [shape: f32[12,8,32], index: 0, kind: input, shape index: {}]   ;;  %s1339_s1 = inlined_call_operand.hbm [shape: f32[32,32], index: 1, kind: input, shape index: {}]   ;;  %s1340_s2 = inlined_call_operand.hbm [shape: f32[8,32], index: 2, kind: input, shape index: {}]   ;;  %s1341_s3 = inlined_call_operand.hbm [shape: f32[12,8,32], index: 3, kind: output, shape index: {0}]   ;;  %s1342_s4 = inlined_call_operand.hbm [shape: f32[8,32], index: 4, kind: output, shape index: {1}]  }
   0x1   :  { %12 = vsyncpa [#allocation3 + $0x1], 0 }
   0x2   :  { %13 = vsyncpa [#allocation6], 0 }
   0x3   :  { %14 = vsyncpa [#allocation4], 0 }
   0x4   :  { %16 = vsyncpa [#allocation4 + $0x1], 0 }
   0x5   :  { %17 = vsyncpa [#allocation10], 0  ;;  %s1099_s15 = smov 0   ;;  %s1101_s16 = smov 0  }
   0x6   :  { %s1103_s17 = smov 0   ;;  %s1105_s18 = smov 0  }
   0x7 LB: > { %s1120_s19 = sadd.s32 4294967295, %s1061_s18   ;;  %s700_s20 = sadd.s32 4294967294, %s1061_s18   ;;  %s1061_s18 = sphi %s1105_s18, %s1368_s18   ;;  %s1057_s17 = sphi %s1103_s17, %s1367_s17   ;;  %s1053_s16 = sphi %s1101_s16, %s1366_s16   ;;  %s1049_s15 = sphi %s1099_s15, %s1365_s15  }
   0x8   : > { %p43_p0 = scmp.ne.s32.totalorder %s1053_s16, %s1049_s15  ;;  %p1344_p1 = scmp.eq.s32.totalorder %s1120_s19, 0 }
   0x9   : > { %p1343_p2 = scmp.eq.s32.totalorder %s1120_s19, 2  ;;  %p115_p3 = scmp.eq.s32.totalorder %s700_s20, 2 }
   0xa   : > { %p1129_p4 = por %p1344_p1, %p43_p0  ;;  %p701_p5 = scmp.ge.s32.totalorder %s1061_s18, 1 }
   0xb   : > { %p1134_p6 = por %p115_p3, %p43_p0  ;;  %p143_p7 = scmp.lt.s32.totalorder %s1061_s18, 4 }
   0xc   : > { %s1348_s21 = scalar_select %p1129_p4, 1, 0 }
   0xd   : > { %s1349_s22 = scalar_select %p1134_p6, 1, 0 }
   0xe   : > { %p1140_p9 = pnand %p701_p5, %p143_p7  ;;  %s1063_s24 = smov [#allocation5]  }
   0xf   : > { %s155_s25 = sshll.u32 %s1063_s24, 4  ;;  %s1064_s27 = smov [#allocation7]   ;;  %s156_s25 = int_to_ptr.vmem [resolvable:$true] %s155_s25 }
  0x10   : > { %s1350_s23 = scalar_select %p1140_p9, 1, 0 }
  0x11   : > { %p813_p10 = pneg %p1140_p9  ;;  %s169_s28 = sshll.u32 %s1064_s27, 4  ;;  %s170_s28 = int_to_ptr.vmem [resolvable:$true] %s169_s28 }
  0x12   : > { %s896_s29 = scalar_lea.vmem %s156_s25, 512  ;;  %p904_p5 = scmp.lt.s32.totalorder %s156_s25, %s156_s25 }
  0x13   : > { %p1148_p11 = pnand %p813_p10, %p1344_p1  ;;  %p897_p13 = scmp.ne.s32.totalorder %s156_s25, %s896_s29 }
  0x14   : > { %p905_p7 = scmp.lt.s32.totalorder %s896_s29, %s896_s29 }
  0x15   : > { %p887_p12 = pneg %p1148_p11 }
  0x16   : > { %p906_p8 = por %p905_p7, %p904_p5 }
  0x17   : > { %p899_p0 = pnand %p897_p13, %p887_p12 }
  0x19   : > { %p900_p3 = pneg %p899_p0 }
  0x1b   : > { %p907_p10 = pnand %p906_p8, %p900_p3 }
  0x1d   : > { %910 = shalt.err (!%p907_p10)
}
  0x1e   : > { %s1065_s30 = smov 128   ;;  %s1066_s5 = smov 8  }
  0x1f   : > { %816 = dma.hbm_to_vmem [thread:$0]  (!%p1148_p11), %s1339_s1, 512, %s156_s25, [#allocation6], %s1065_s30, %s1065_s30, %s1066_s5  }
  0x20   : > { %s922_s8 = scalar_lea.vmem %s170_s28, 128  ;;  %p930_p8 = scmp.lt.s32.totalorder %s170_s28, %s170_s28 }
  0x21   : > { %p923_p13 = scmp.ne.s32.totalorder %s170_s28, %s922_s8  ;;  %p931_p3 = scmp.lt.s32.totalorder %s922_s8, %s922_s8 }
  0x23   : > { %p925_p0 = pnand %p923_p13, %p887_p12  ;;  %p932_p7 = por %p931_p3, %p930_p8 }
  0x25   : > { %p926_p5 = pneg %p925_p0 }
  0x27   : > { %p933_p10 = pnand %p932_p7, %p926_p5 }
  0x29   : > { %936 = shalt.err (!%p933_p10)
}
  0x2a   : > { %819 = dma.hbm_to_vmem [thread:$0]  (!%p1148_p11), %s1340_s2, 128, %s170_s28, [#allocation6]  }
  0x2b   : > { %s1174_s11 = sadd.s32 1, %s1061_s18   ;;  %s30_s12 = sadd.s32 1, %s1057_s17 }
  0x2c   : > { %s27_s13 = ssub.s32 %s1061_s18, %s1174_s11  ;;  %p37_p12 = scmp.ne.s32.totalorder %s1057_s17, %s1053_s16 }
  0x2d   : > { %p28_p13 = scmp.eq.s32.totalorder %s27_s13, 0  ;;  %p38_p0 = scmp.eq.s32.totalorder %s1061_s18, 0 }
  0x2e   : > { %p1184_p5 = por %p1343_p2, %p37_p12  ;;  %p830_p8 = scmp.lt.s32.totalorder %s1061_s18, 3 }
  0x2f   : > { %s1190_s20 = scalar_select %p28_p13, %s1057_s17, %s30_s12  }
  0x30   : > { %s1352_s14 = scalar_select %p1184_p5, 1, 0 }
  0x31   : > { %p39_p3 = por %p38_p0, %p37_p12  ;;  %s180_s24 = sand.u32 1, %s1057_s17  }
  0x32   : > { %s705_s25 = sshll.u32 %s180_s24, 5  ;;  %s731_s26 = sshll.u32 %s1061_s18, 9 }
  0x33   : > { %s1197_s29 = scalar_lea.hbm %s1338_s0, %s731_s26  ;;  %s184_s6 = scalar_lea.vmem [#allocation2], %s705_s25 }
  0x34   : > { %s191_s7 = sshll.u32 %s184_s6, 4  ;;  %p1201_p11 = pnand %p830_p8, %p39_p3  ;;  %s1199_s7 = int_to_ptr.vmem [resolvable:$true] %s191_s7 }
  0x35   : > { %s1205_s9 = scalar_lea.sflag [#allocation3], %s180_s24  ;;  %s937_s10 = scalar_lea.hbm %s1197_s29, 512 }
  0x36   : > { %p938_p7 = scmp.ne.s32.totalorder %s1197_s29, %s937_s10  ;;  %p939_p10 = pneg %p1201_p11 }
  0x37   : > { %s942_s25 = scalar_lea.hbm %s1338_s0, 1536  ;;  %p943_p0 = scmp.lt.s32.totalorder %s1197_s29, %s1338_s0 }
  0x38   : > { %p940_p12 = pnand %p939_p10, %p938_p7  ;;  %p944_p8 = scmp.lt.s32.totalorder %s942_s25, %s937_s10 }
  0x3a   : > { %p941_p13 = pneg %p940_p12  ;;  %p945_p3 = por %p944_p8, %p943_p0 }
  0x3c   : > { %p946_p2 = pnand %p945_p3, %p941_p13 }
  0x3e   : > { %949 = shalt.err (!%p946_p2)
}
  0x3f   : > { %s950_s24 = scalar_lea.vmem %s1199_s7, 512  ;;  %s1067_s28 = smov [#allocation2]  }
  0x40   : > { %p951_p1 = scmp.ne.s32.totalorder %s1199_s7, %s950_s24  ;;  %s955_s6 = sshll.u32 %s1067_s28, 4  ;;  %s956_s6 = int_to_ptr.vmem [resolvable:$false] %s955_s6 }
  0x41   : > { %s957_s12 = scalar_lea.vmem %s956_s6, 1024  ;;  %p958_p12 = scmp.lt.s32.totalorder %s1199_s7, %s956_s6 }
  0x42   : > { %p953_p6 = pnand %p951_p1, %p939_p10  ;;  %p959_p5 = scmp.lt.s32.totalorder %s957_s12, %s950_s24 }
  0x44   : > { %p954_p7 = pneg %p953_p6  ;;  %p960_p4 = por %p959_p5, %p958_p12 }
  0x46   : > { %p961_p9 = pnand %p960_p4, %p954_p7 }
  0x48   : > { %964 = shalt.err (!%p961_p9)
}
  0x49   : > { %823 = dma.hbm_to_vmem [thread:$0]  (!%p1201_p11), %s1197_s29, 512, %s1199_s7, %s1205_s9, %s1065_s30, %s1065_s30, %s1066_s5  }
  0x4a   : > { %p1354_p1 = scmp.ne.s32.totalorder %s1350_s23, 0 }
  0x4b   : > { %s1232_s10 = sand.u32 (!%p1354_p1), 1, %s1053_s16   ;;  %p1355_p2 = scmp.ne.s32.totalorder (!%p1354_p1), %s1348_s21, 0 }
  0x4c   : > { %203 = sbr.rel (%p1354_p1) target bundleno = 970 (0x3ca), region = 32  ;;  %s709_s13 = sshll.u32 (!%p1354_p1), %s1232_s10, 5 }
  0x4d   : > { %s206_s25 = scalar_lea.sflag (!%p1354_p1), [#allocation3], %s1232_s10  ;;  %s1236_s26 = scalar_lea.vmem (!%p1354_p1), [#allocation2], %s709_s13 }
  0x51   : > { %1032 = dma.done.wait (%p1355_p2), %s206_s25, 512  }
  0x52   : > { %1034 = vsyncadd (%p1355_p2), %s206_s25, 4294966784  ;;  %p1356_p4 = scmp.eq.s32.totalorder %s1120_s19, 0 }
  0x54   : > { %1036 = dma.done.wait (%p1356_p4), [#allocation6], 640   ;;  %p1357_p6 = pmov %p1356_p4 }
  0x55   : > { %s1246_s23 = scalar_lea.vmem [#allocation8], %s709_s13  ;;  %p1358_p9 = scmp.ne.s32.totalorder %s1120_s19, 0 }
  0x56   : > { %1038 = vsyncadd (%p1357_p6), [#allocation6], 4294966656 }
  0x57   : > { %247 = sbr.rel (%p1358_p9) target bundleno = 94 (0x5e), region = 48 }
  0x5c   : > { %v248_v0 = vld [vmem:[#allocation7] sm:$0xff]  ;;  %vm249_vm0 = vcmask 261120  }
  0x5d   : > { %250 = vst.msk [vmem:[#allocation9] sm:$0xff] %vm249_vm0, %v248_v0 }
  0x5e PF: > { %v254_v1 = vld [vmem:[#allocation5 + $0x18] sm:$0xff]  ;;  %v1068_v2 = vmov 0.0   ;;  %v253_v3 = vld [vmem:[#allocation5 + $0x10] sm:$0xff]  ;;  %vm1069_vm1 = vmmov 0   ;;  %v252_v4 = vld [vmem:[#allocation5 + $0x8] sm:$0xff]  ;;  %vm257_vm2 = vcmask 261120  }
  0x5f   : > { %753 = vmatprep.subr.mxu0 %v1068_v2  ;;  %761 = vmatprep.mubr.msk.f32.mxu0 %vm1069_vm1, %v1068_v2  ;;  %v251_v5 = vld [vmem:[#allocation5] sm:$0xff]  ;;  %v715_v12 = vld [vmem:[%s1236_s26 + $0x8] sm:$0xff]  ;;  %v718_v17 = vld [vmem:[%s1236_s26 + $0x10] sm:$0xff]  ;;  %s732_s21 = sshll.u32 %s1120_s19, 9  ;;  %s586_s30 = sshll.u32 %s1246_s23, 4  ;;  %s1275_s30 = int_to_ptr.vmem [resolvable:$true] %s586_s30 }
  0x60   : > { %754 = vmatpush3.msra.mxu0 %v254_v1  ;;  %764 = vmatprep.subr.mxu1 %v1068_v2  ;;  %v256_v7 = vld [vmem:[%s1236_s26] sm:$0xff]  ;;  %v721_v22 = vld [vmem:[%s1236_s26 + $0x18] sm:$0xff]  ;;  %s1070_s5 = smov [#allocation9]   ;;  %s1273_s9 = scalar_lea.hbm %s1341_s3, %s732_s21 }
  0x61   : > { %755 = vmatprep.subr.mxu0 %v1068_v2  ;;  %765 = vmatpush3.msra.mxu1 %v254_v1  ;;  %s600_s29 = sshll.u32 %s1070_s5, 4  ;;  %s573_s27 = scalar_lea.sflag [#allocation4], %s1232_s10  ;;  %s1277_s29 = int_to_ptr.vmem [resolvable:$true] %s600_s29 }
  0x62   : > { %756 = vmatpush3.msra.mxu0 %v253_v3  ;;  %766 = vmatprep.subr.mxu1 %v1068_v2  ;;  %s965_s24 = scalar_lea.vmem %s1275_s30, 512  ;;  %p1359_p11 = scmp.ne.s32.totalorder %s1352_s14, 0 }
  0x63   : > { %757 = vmatprep.subr.mxu0 %v1068_v2  ;;  %767 = vmatpush3.msra.mxu1 %v253_v3  ;;  %p966_p5 = scmp.ne.s32.totalorder %s1275_s30, %s965_s24  ;;  %s1071_s28 = smov [#allocation8]  }
  0x64   : > { %758 = vmatpush3.msra.mxu0 %v252_v4  ;;  %v255_v6 = vld [vmem:[#allocation9] sm:$0xff]  ;;  %768 = vmatprep.subr.mxu1 %v1068_v2  ;;  %s969_s6 = sshll.u32 %s1071_s28, 4  ;;  %s970_s6 = int_to_ptr.vmem [resolvable:$false] %s969_s6 }
  0x65   : > { %759 = vmatprep.subr.mxu0 %v1068_v2  ;;  %769 = vmatpush3.msra.mxu1 %v252_v4  ;;  %p967_p10 = pnand %p966_p5, %p1359_p11  ;;  %s971_s12 = scalar_lea.vmem %s970_s6, 1024 }
  0x66   : > { %760 = vmatpush3.msra.mxu0 %v251_v5  ;;  %770 = vmatprep.subr.mxu1 %v1068_v2  ;;  %p972_p0 = scmp.lt.s32.totalorder %s1275_s30, %s970_s6  ;;  %p973_p8 = scmp.lt.s32.totalorder %s971_s12, %s965_s24 }
  0x67   : > { %762 = vmatmul.mubr.msk.f32.vlgmr.msra.gmra.mxu0 %vm257_vm2, %v255_v6  ;;  %771 = vmatpush3.msra.mxu1 %v251_v5  ;;  %p968_p13 = pneg %p967_p10 }
  0x68   : > { %772 = vmatprep.mubr.msk.f32.mxu1 %vm1069_vm1, %v1068_v2  ;;  %775 = vmatprep.subr.mxu0 %v1068_v2  ;;  %p974_p3 = por %p973_p8, %p972_p0 }
  0x69   : > { %776 = vmatpush3.msra.mxu0 %v254_v1  ;;  %783 = vmatprep.mubr.msk.f32.mxu0 %vm1069_vm1, %v1068_v2 }
  0x6a   : > { %777 = vmatprep.subr.mxu0 %v1068_v2  ;;  %786 = vmatprep.subr.mxu1 %v1068_v2  ;;  %p975_p7 = pnand %p974_p3, %p968_p13 }
  0x6b   : > { %778 = vmatpush3.msra.mxu0 %v253_v3 }
  0x6c   : > { %779 = vmatprep.subr.mxu0 %v1068_v2 }
  0x6d   : > { %780 = vmatpush3.msra.mxu0 %v252_v4 }
  0x6e   : > { %781 = vmatprep.subr.mxu0 %v1068_v2 }
  0x6f   : > { %782 = vmatpush3.msra.mxu0 %v251_v5 }
 0x127   : > { %v327_v8 = vpop.f32.mrf.mxu0 }
 0x128   : > { %v331_v9 = vadd.f32 %v327_v8, %v256_v7 }
 0x129   : > { %v763_v10 = vpop.f32.mrf.mxu0 }
 0x12a   : > { %877 = vtanh.f32 %v331_v9 }
 0x137   : > { %v878_v11 = vpop.eup %877 }
 0x138   : > { %333 = vst.msk [vmem:[%s1246_s23] sm:$0xff] %vm257_vm2, %v878_v11  ;;  %773 = vmatmul.mubr.msk.f32.vlgmr.msra.gmra.mxu1 %vm257_vm2, %v878_v11 }
 0x139   : > { %787 = vmatpush3.msra.mxu1 %v254_v1  ;;  %794 = vmatprep.mubr.msk.f32.mxu1 %vm1069_vm1, %v1068_v2 }
 0x13a   : > { %788 = vmatprep.subr.mxu1 %v1068_v2 }
 0x13b   : > { %789 = vmatpush3.msra.mxu1 %v253_v3 }
 0x13c   : > { %790 = vmatprep.subr.mxu1 %v1068_v2 }
 0x13d   : > { %791 = vmatpush3.msra.mxu1 %v252_v4 }
 0x13e   : > { %792 = vmatprep.subr.mxu1 %v1068_v2 }
 0x13f   : > { %793 = vmatpush3.msra.mxu1 %v251_v5 }
 0x1f8   : > { %v405_v13 = vpop.f32.mrf.mxu1 }
 0x1f9   : > { %v409_v14 = vadd.f32 %v715_v12, %v405_v13 }
 0x1fa   : > { %v774_v15 = vpop.f32.mrf.mxu1 }
 0x1fb   : > { %879 = vtanh.f32 %v409_v14 }
 0x208   : > { %v880_v16 = vpop.eup %879 }
 0x209   : > { %717 = vst.msk [vmem:[%s1246_s23 + $0x8] sm:$0xff] %vm257_vm2, %v880_v16  ;;  %784 = vmatmul.mubr.msk.f32.vlgmr.msra.gmra.mxu0 %vm257_vm2, %v880_v16 }
 0x2c9   : > { %v484_v18 = vpop.f32.mrf.mxu0 }
 0x2ca   : > { %v488_v19 = vadd.f32 %v718_v17, %v484_v18 }
 0x2cb   : > { %v785_v20 = vpop.f32.mrf.mxu0 }
 0x2cc   : > { %881 = vtanh.f32 %v488_v19 }
 0x2d9   : > { %v882_v21 = vpop.eup %881 }
 0x2da   : > { %720 = vst.msk [vmem:[%s1246_s23 + $0x10] sm:$0xff] %vm257_vm2, %v882_v21  ;;  %795 = vmatmul.mubr.msk.f32.vlgmr.msra.gmra.mxu1 %vm257_vm2, %v882_v21 }
 0x39a   : > { %v563_v23 = vpop.f32.mrf.mxu1 }
 0x39b   : > { %v567_v24 = vadd.f32 %v721_v22, %v563_v23 }
 0x39c   : > { %v796_v25 = vpop.f32.mrf.mxu1 }
 0x39d   : > { %883 = vtanh.f32 %v567_v24 }
 0x3aa   : > { %v884_v26 = vpop.eup %883 }
 0x3ab   : > { %723 = vst.msk [vmem:[%s1246_s23 + $0x18] sm:$0xff] %vm257_vm2, %v884_v26  ;;  %571 = vst.msk [vmem:[#allocation9] sm:$0xff] %vm257_vm2, %v884_v26 }
 0x3ac   : > { %978 = shalt.err (!%p975_p7)
}
 0x3ad   : > { %s979_s13 = scalar_lea.hbm %s1273_s9, 512  ;;  %s983_s23 = scalar_lea.hbm %s1341_s3, 1536 }
 0x3ae   : > { %p980_p12 = scmp.ne.s32.totalorder %s1273_s9, %s979_s13  ;;  %p984_p4 = scmp.lt.s32.totalorder %s1273_s9, %s1341_s3 }
 0x3af   : > { %p985_p6 = scmp.lt.s32.totalorder %s983_s23, %s979_s13 }
 0x3b0   : > { %p981_p1 = pnand %p980_p12, %p1359_p11 }
 0x3b1   : > { %p986_p9 = por %p985_p6, %p984_p4 }
 0x3b2   : > { %p982_p2 = pneg %p981_p1 }
 0x3b4   : > { %p987_p5 = pnand %p986_p9, %p982_p2 }
 0x3b6   : > { %990 = shalt.err (!%p987_p5)
}
 0x3b7   : > { %s1072_s7 = smov 128   ;;  %s1073_s8 = smov 8  }
 0x3b8   : > { %807 = dma.vmem_to_hbm [thread:$0]  (%p1359_p11), %s1275_s30, 512, %s1273_s9, %s573_s27, %s1072_s7, %s1072_s7, %s1073_s8  }
 0x3b9   : > { %s991_s24 = scalar_lea.vmem %s1277_s29, 128  ;;  %p1360_p13 = scmp.eq.s32.totalorder %s1120_s19, 2 }
 0x3ba   : > { %p992_p10 = scmp.ne.s32.totalorder %s1277_s29, %s991_s24  ;;  %p998_p3 = scmp.lt.s32.totalorder %s1277_s29, %s1277_s29 }
 0x3bb   : > { %p999_p7 = scmp.lt.s32.totalorder %s991_s24, %s991_s24 }
 0x3bc   : > { %p993_p0 = pnand %p992_p10, %p1360_p13 }
 0x3bd   : > { %p1000_p12 = por %p999_p7, %p998_p3 }
 0x3be   : > { %p994_p8 = pneg %p993_p0 }
 0x3c0   : > { %p1001_p1 = pnand %p1000_p12, %p994_p8 }
 0x3c2   : > { %1004 = shalt.err (!%p1001_p1)
}
 0x3c3   : > { %p1361_p2 = pmov %p1360_p13 }
 0x3c5   : > { %809 = dma.vmem_to_hbm [thread:$0]  (%p1361_p2), %s1277_s29, 128, %s1342_s4, [#allocation10]  }
 0x3c6   : > { %p1362_p11 = pmov %p1361_p2 }
 0x3c7   : > { %p1363_p4 = pmov %p1361_p2 }
 0x3c8   : > { %1040 = dma.done.wait (%p1362_p11), [#allocation10], 128  }
 0x3c9   : > { %1042 = vsyncadd (%p1363_p4), [#allocation10], 4294967168 }
 0x3ca PF: > { %p835_p6 = scmp.ge.s32.totalorder %s1061_s18, 2  ;;  %s616_s14 = sand.u32 1, %s1049_s15  }
 0x3cb   : > { %p1364_p9 = scmp.ne.s32.totalorder %s1349_s22, 0  ;;  %s617_s10 = scalar_lea.sflag [#allocation4], %s616_s14 }
 0x3cd   : > { %p825_p5 = pnand %p835_p6, %p1364_p9 }
 0x3cf   : > { %p826_p10 = pneg %p825_p5 }
 0x3d1   : > { %1044 = dma.done.wait (%p826_p10), %s617_s10, 512  }
 0x3d2   : > { %1046 = vsyncadd (%p826_p10), %s617_s10, 4294966784  ;;  %p20_p13 = scmp.ge.s32.totalorder %s1174_s11, 5   ;;  %s1365_s15 = smov %s1053_s16 }
 0x3d3   : > { %s1366_s16 = smov %s1057_s17  ;;  %s1367_s17 = smov %s1190_s20 }
 0x3d4   : > { %s1368_s18 = smov %s1174_s11  ;;  %22 = sbr.rel (!%p20_p13) target bundleno = 7 (0x7), region = 103 }
 0x3d9   :  { %622 = vsyncpa [#allocation3], 1 }
 0x3da   :  { %624 = vsyncpa [#allocation3 + $0x1], 1 }
 0x3db   :  { %625 = vsyncpa [#allocation6], 1 }
 0x3dc   :  { %626 = vsyncpa [#allocation4], 1 }
 0x3dd   :  { %628 = vsyncpa [#allocation4 + $0x1], 1 }
 0x3de   :  { %629 = vsyncpa [#allocation10], 1 }

</bundles_post_ra>
